<compile_context>
chip_gen: v5e
topology: v5e:2x2
jax: 0.10.0
libtpu: 0.0.40
codegen_flags: <defaults>
</compile_context>

<pallas_src>
import functools

import jax
import jax.numpy as jnp
from jax.experimental import pallas as pl
from jax.experimental.pallas import tpu as pltpu

_EPS = 1e-6  # matches torch.nn.functional.pairwise_distance default eps
_SUBLANE = {1: 32, 2: 16, 4: 8, 8: 8}  # sublane packing per itemsize


def _round_up(x, m):
    return ((x + m - 1) // m) * m


def _vmem_limit_bytes():
    """Generation-aware VMEM limit (v7x: 64 MiB/TC, v5e/v6e: 128 MiB)."""
    try:
        cap = int(pltpu.get_tpu_info().vmem_capacity_bytes)
    except Exception:  # interpret mode / unknown target: assume smallest (v7x)
        cap = 64 * 1024 * 1024
    # Leave headroom for compiler-internal scratch.
    return max(32 * 1024 * 1024, min(int(cap * 0.75), cap - (16 << 20)))


def _pick_tiles(batch, feat, itemsize, vmem_limit):
    """Choose (tile_b, tile_k) so the per-step working set fits the VMEM budget.

    Working set per grid step:
      2 inputs x 2 pipeline buffers in native dtype (DMA streams)
      + ~4 full-tile f32 temporaries (x1_f32, x2_f32, diff, diff*diff),
    both counted with the minor dim padded to 128 lanes.
    """
    sub = _SUBLANE.get(itemsize, 8)
    budget = int(vmem_limit * 0.70)  # extra headroom for scratch / masks
    batch_pad = _round_up(batch, sub)

    def bytes_per_row(cols):
        lanes = _round_up(cols, 128)
        native = 2 * 2 * lanes * itemsize   # 2 inputs x 2 pipeline buffers
        temps = 4 * lanes * 4               # f32 upcast temporaries
        return native + temps

    # Preferred: no feature split (feature dim streamed whole).
    tb = (budget // bytes_per_row(feat) // sub) * sub
    if tb >= batch_pad or tb >= 1024:
        tb = max(sub, min(tb, batch_pad))
        tk = feat
    else:
        # Wide embeddings: split the feature axis so batch tiles stay large.
        tb = max(sub, min(batch_pad, 1024))
        per_col = tb * (2 * 2 * itemsize + 4 * 4)
        tk = (budget // per_col // 128) * 128
        tk = max(128, tk)
        if tk >= feat:
            tk = feat

    # Give both v7x TensorCores work when the whole batch fit in one tile.
    if tb >= batch_pad and batch_pad >= 2 * sub:
        tb = _round_up((batch_pad + 1) // 2, sub)

    return tb, tk


def _contrastive_loss_kernel(x1_ref, x2_ref, label_ref, out_ref, d2_ref, *,
                             margin, batch, feat, tile_b, tile_k, mask_cols):
    i = pl.program_id(0)          # batch tile
    k = pl.program_id(1)          # feature tile (reduction axis, innermost)

    @pl.when(k == 0)
    def _init():
        d2_ref[...] = jnp.zeros_like(d2_ref)

    x1 = x1_ref[...].astype(jnp.float32)        # (TB, TK)
    x2 = x2_ref[...].astype(jnp.float32)        # (TB, TK)
    diff = x1 - x2 + _EPS                       # pairwise_distance adds eps to diff
    sq = diff * diff
    if mask_cols:  # static: feature dim not divisible by tile_k -> padded cols
        col = jax.lax.broadcasted_iota(jnp.int32, (tile_b, tile_k), 1) + k * tile_k
        sq = jnp.where(col < feat, sq, 0.0)
    d2_ref[...] += jnp.sum(sq, axis=-1, keepdims=True)     # (TB, 1)

    @pl.when(k == pl.num_programs(1) - 1)
    def _finalize():
        label = label_ref[...].astype(jnp.float32)          # (TB, 1)
        d2 = d2_ref[...]
        d = jnp.sqrt(d2)
        hinge = jnp.maximum(margin - d, 0.0)
        per_row = (1.0 - label) * d2 + label * (hinge * hinge)
        # Mask rows past the true batch size (padded last tile).  Must stay a
        # jnp.where so garbage/NaN in discarded rows cannot leak into the sum.
        row = jax.lax.broadcasted_iota(jnp.int32, (tile_b, 1), 0) + i * tile_b
        per_row = jnp.where(row < batch, per_row, 0.0)
        # Lane-dense unmasked (1, 128) store; wrapper reads lane 0 per block.
        out_ref[...] = jnp.full((1, 128), jnp.sum(per_row), dtype=jnp.float32)


def contrastive_loss(output1, output2, label, margin=1.0):
    """Pallas TPU implementation of ContrastiveLoss.forward.

    output1, output2: (B, D) (or (B, ...) -> flattened) feature matrices.
    label:            (B,) or (B, 1) binary same/different labels.
    Returns a scalar float32 loss.
    """
    B = output1.shape[0]
    output1 = jnp.reshape(output1, (B, -1))
    output2 = jnp.reshape(output2, (B, -1))
    D = output1.shape[1]
    label2d = jnp.reshape(label, (B, 1)).astype(jnp.float32)

    itemsize = jnp.dtype(output1.dtype).itemsize
    vmem_limit = _vmem_limit_bytes()
    tb, tk = _pick_tiles(B, D, itemsize, vmem_limit)
    num_b_tiles = pl.cdiv(B, tb)
    num_k_tiles = pl.cdiv(D, tk)

    kernel = functools.partial(
        _contrastive_loss_kernel,
        margin=float(margin), batch=B, feat=D,
        tile_b=tb, tile_k=tk, mask_cols=(D % tk != 0),
    )

    partials = pl.pallas_call(
        kernel,
        out_shape=jax.ShapeDtypeStruct((1, num_b_tiles * 128), jnp.float32),
        grid=(num_b_tiles, num_k_tiles),
        in_specs=[
            pl.BlockSpec((tb, tk), lambda i, k: (i, k)),   # output1 tile
            pl.BlockSpec((tb, tk), lambda i, k: (i, k)),   # output2 tile
            pl.BlockSpec((tb, 1), lambda i, k: (i, 0)),    # label tile
        ],
        out_specs=pl.BlockSpec((1, 128), lambda i, k: (0, i)),
        scratch_shapes=[pltpu.VMEM((tb, 1), jnp.float32)],  # d^2 accumulator
        compiler_params=pltpu.CompilerParams(
            dimension_semantics=("parallel", "arbitrary"),
            vmem_limit_bytes=vmem_limit,
        ),
        cost_estimate=pl.CostEstimate(
            flops=4 * B * D + 10 * B,
            transcendentals=B,
            bytes_accessed=2 * B * D * itemsize + 4 * B + num_b_tiles * 128 * 4,
        ),
    )(output1, output2, label2d)

    total = jnp.sum(partials.reshape(num_b_tiles, 128)[:, 0])
    return total * (1.0 / B)


def _reference_loss(output1, output2, label, margin=1.0):
    # Pure-JAX reference mirroring the PyTorch forward.
    x1 = output1.astype(jnp.float32).reshape(output1.shape[0], -1)
    x2 = output2.astype(jnp.float32).reshape(output2.shape[0], -1)
    d = jnp.sqrt(jnp.sum((x1 - x2 + _EPS) ** 2, axis=-1))
    label = jnp.reshape(label, d.shape).astype(jnp.float32)
    return jnp.mean((1.0 - label) * d ** 2
                    + label * jnp.maximum(margin - d, 0.0) ** 2)


if __name__ == "__main__":
    key = jax.random.PRNGKey(0)
    k1, k2, k3 = jax.random.split(key, 3)

    B, D = 8, 32  # small flat-embedding shapes consistent with the module
    output1 = jax.random.normal(k1, (B, D), dtype=jnp.float32)
    output2 = jax.random.normal(k2, (B, D), dtype=jnp.float32)
    # Binary same/different labels, as used with contrastive loss.
    label = jax.random.bernoulli(k3, 0.5, (B,)).astype(jnp.float32)

    loss = contrastive_loss(output1, output2, label, margin=1.0)
    loss = jax.block_until_ready(loss)

    ref = _reference_loss(output1, output2, label, margin=1.0)
    assert jnp.allclose(loss, ref, atol=1e-5, rtol=1e-5), (loss, ref)

    print("KERNEL_OK")
</pallas_src>

<mosaic_0001>
module attributes {stable_mosaic.version = 11 : i64} {
  func.func @_contrastive_loss_kernel(%arg0: i32, %arg1: i32, %arg2: memref<8x32xf32, #tpu.memory_space<vmem>>, %arg3: memref<8x32xf32, #tpu.memory_space<vmem>>, %arg4: memref<8x1xf32, #tpu.memory_space<vmem>>, %arg5: memref<1x128xf32, #tpu.memory_space<vmem>>, %arg6: memref<8x1xf32, #tpu.memory_space<vmem>>) attributes {dimension_semantics = [#tpu.dimension_semantics<parallel>, #tpu.dimension_semantics<arbitrary>], iteration_bounds = array<i64: 1, 1>, scalar_prefetch = 0 : i64, scratch_operands = 1 : i64, tpu.core_type = #tpu.core_type<tc>, window_params = [{transform_indices = @transform_0, window_bounds = array<i64: 8, 32>}, {transform_indices = @transform_1, window_bounds = array<i64: 8, 32>}, {transform_indices = @transform_2, window_bounds = array<i64: 8, 1>}, {transform_indices = @transform_3, window_bounds = array<i64: 1, 128>}]} {
    %c0_i32 = arith.constant 0 : i32
    %0 = arith.cmpi eq, %arg1, %c0_i32 : i32
    %1 = arith.extui %0 : i1 to i32
    %c0_i32_0 = arith.constant 0 : i32
    %2 = arith.cmpi ne, %1, %c0_i32_0 : i32
    scf.if %2 {
      %cst_11 = arith.constant 0.000000e+00 : f32
      %17 = vector.broadcast %cst_11 : f32 to vector<8x1xf32>
      %c0_12 = arith.constant 0 : index
      %c0_13 = arith.constant 0 : index
      %18 = vector.load %arg6[%c0_12, %c0_13] : memref<8x1xf32, #tpu.memory_space<vmem>>, vector<8x1xf32>
      tpu.vector_store %arg6[%c0_12, %c0_13], %17 {strides = array<i32>} : memref<8x1xf32, #tpu.memory_space<vmem>>, vector<8x1xf32>,
    } else {
    }
    %c0 = arith.constant 0 : index
    %c0_1 = arith.constant 0 : index
    %3 = vector.load %arg2[%c0, %c0_1] : memref<8x32xf32, #tpu.memory_space<vmem>>, vector<8x32xf32>
    %c0_2 = arith.constant 0 : index
    %c0_3 = arith.constant 0 : index
    %4 = vector.load %arg3[%c0_2, %c0_3] : memref<8x32xf32, #tpu.memory_space<vmem>>, vector<8x32xf32>
    %5 = arith.subf %3, %4 : vector<8x32xf32>
    %cst = arith.constant 9.99999997E-7 : f32
    %6 = vector.broadcast %cst : f32 to vector<8x32xf32>
    %7 = arith.addf %5, %6 : vector<8x32xf32>
    %8 = arith.mulf %7, %7 : vector<8x32xf32>
    %c0_4 = arith.constant 0 : index
    %c0_5 = arith.constant 0 : index
    %9 = vector.load %arg6[%c0_4, %c0_5] : memref<8x1xf32, #tpu.memory_space<vmem>>, vector<8x1xf32>
    %cst_6 = arith.constant dense<0.000000e+00> : vector<8xf32>
    %10 = vector.multi_reduction <add>, %8, %cst_6 [1] : vector<8x32xf32> to vector<8xf32>
    %11 = vector.shape_cast %10 : vector<8xf32> to vector<8x1xf32>
    %12 = arith.addf %9, %11 : vector<8x1xf32>
    %c0_7 = arith.constant 0 : index
    %c0_8 = arith.constant 0 : index
    %13 = vector.load %arg6[%c0_7, %c0_8] : memref<8x1xf32, #tpu.memory_space<vmem>>, vector<8x1xf32>
    tpu.vector_store %arg6[%c0_7, %c0_8], %12 {strides = array<i32>} : memref<8x1xf32, #tpu.memory_space<vmem>>, vector<8x1xf32>,
    %c0_i32_9 = arith.constant 0 : i32
    %14 = arith.cmpi eq, %arg1, %c0_i32_9 : i32
    %15 = arith.extui %14 : i1 to i32
    %c0_i32_10 = arith.constant 0 : i32
    %16 = arith.cmpi ne, %15, %c0_i32_10 : i32
    scf.if %16 {
      %c0_11 = arith.constant 0 : index
      %c0_12 = arith.constant 0 : index
      %17 = vector.load %arg4[%c0_11, %c0_12] : memref<8x1xf32, #tpu.memory_space<vmem>>, vector<8x1xf32>
      %c0_13 = arith.constant 0 : index
      %c0_14 = arith.constant 0 : index
      %18 = vector.load %arg6[%c0_13, %c0_14] : memref<8x1xf32, #tpu.memory_space<vmem>>, vector<8x1xf32>
      %19 = math.sqrt %18 : vector<8x1xf32>
      %cst_15 = arith.constant 1.000000e+00 : f32
      %20 = vector.broadcast %cst_15 : f32 to vector<8x1xf32>
      %21 = arith.subf %20, %19 : vector<8x1xf32>
      %cst_16 = arith.constant 0.000000e+00 : f32
      %22 = vector.broadcast %cst_16 : f32 to vector<8x1xf32>
      %23 = arith.maximumf %21, %22 : vector<8x1xf32>
      %cst_17 = arith.constant 1.000000e+00 : f32
      %24 = vector.broadcast %cst_17 : f32 to vector<8x1xf32>
      %25 = arith.subf %24, %17 : vector<8x1xf32>
      %26 = arith.mulf %25, %18 : vector<8x1xf32>
      %27 = arith.mulf %23, %23 : vector<8x1xf32>
      %28 = arith.mulf %17, %27 : vector<8x1xf32>
      %29 = arith.addf %26, %28 : vector<8x1xf32>
      %30 = tpu.iota {dimensions = array<i32: 0>} : vector<8x1xi32>
      %c8_i32 = arith.constant 8 : i32
      %31 = arith.muli %arg0, %c8_i32 : i32
      %32 = vector.broadcast %31 : i32 to vector<8x1xi32>
      %33 = arith.addi %30, %32 : vector<8x1xi32>
      %c8_i32_18 = arith.constant 8 : i32
      %34 = vector.broadcast %c8_i32_18 : i32 to vector<8x1xi32>
      %35 = arith.cmpi slt, %33, %34 : vector<8x1xi32>
      %cst_19 = arith.constant 0.000000e+00 : f32
      %36 = vector.broadcast %cst_19 : f32 to vector<8x1xf32>
      %37 = arith.select %35, %29, %36 : vector<8x1xi1>, vector<8x1xf32>
      %38 = vector.shape_cast %37 : vector<8x1xf32> to vector<1x8x1xf32>
      %cst_20 = arith.constant dense<0.000000e+00> : vector<1xf32>
      %39 = vector.multi_reduction <add>, %38, %cst_20 [1, 2] : vector<1x8x1xf32> to vector<1xf32>
      %40 = vector.shape_cast %39 : vector<1xf32> to vector<1x1x1xf32>
      %41 = vector.extract %40[0, 0, 0] : f32 from vector<1x1x1xf32>
      %42 = vector.broadcast %41 : f32 to vector<1x128xf32>
      %c0_21 = arith.constant 0 : index
      %c0_22 = arith.constant 0 : index
      %43 = vector.load %arg5[%c0_21, %c0_22] : memref<1x128xf32, #tpu.memory_space<vmem>>, vector<1x128xf32>
      tpu.vector_store %arg5[%c0_21, %c0_22], %42 {strides = array<i32>} : memref<1x128xf32, #tpu.memory_space<vmem>>, vector<1x128xf32>,
    } else {
    }
    return
  }
  func.func @transform_0(%arg0: i32, %arg1: i32) -> (i32, i32) {
    %c0_i32 = arith.constant 0 : i32
    return %arg0, %arg1 : i32, i32
  }
  func.func @transform_1(%arg0: i32, %arg1: i32) -> (i32, i32) {
    %c0_i32 = arith.constant 0 : i32
    return %arg0, %arg1 : i32, i32
  }
  func.func @transform_2(%arg0: i32, %arg1: i32) -> (i32, i32) {
    %c0_i32 = arith.constant 0 : i32
    %c0_i32_0 = arith.constant 0 : i32
    return %arg0, %c0_i32 : i32, i32
  }
  func.func @transform_3(%arg0: i32, %arg1: i32) -> (i32, i32) {
    %c0_i32 = arith.constant 0 : i32
    %c0_i32_0 = arith.constant 0 : i32
    return %c0_i32, %arg0 : i32, i32
  }
}

</mosaic_0001>

<bundles_post_ra>
// kernel: tpu_custom_call.1
= control target key start
LH: loop header
LB: loop body
LE: loop exit
PB: predicated region body
PF: predicated region fallthrough
CT: control target
= control target key end

     0   :  { %8 = vsyncpa [#allocation4], 0  ;;  %s205_s0 = inlined_call_operand.vmem [shape: f32[8,32], index: 0, kind: input, shape index: {}]   ;;  %s206_s1 = inlined_call_operand.hbm [shape: f32[8,32], index: 1, kind: input, shape index: {}]   ;;  %s207_s2 = inlined_call_operand.vmem [shape: f32[8,1], index: 2, kind: input, shape index: {}]   ;;  %s208_s3 = inlined_call_operand.hbm [shape: f32[1,128], index: 3, kind: output, shape index: {}]  }
   0x1   :  { %9 = vsyncpa [#allocation5], 0  ;;  %s17_s14 = sshll.u32 %s206_s1, 4  ;;  %s167_s15 = smov [#allocation3]   ;;  %s18_s14 = int_to_ptr.hbm [resolvable:$true] %s17_s14 }
   0x2   :  { %s19_s16 = sshll.u32 %s167_s15, 4  ;;  %s20_s16 = int_to_ptr.vmem [resolvable:$true] %s19_s16 }
   0x3   :  { %22 = dma.hbm_to_vmem [thread:$0]  %s18_s14, 128, %s20_s16, [#allocation4]  }
   0x4   :  { %163 = dma.done.wait [#allocation4], 128  }
   0x5   :  { %164 = vsyncadd [#allocation4], 4294967168  ;;  %vm33_vm0 = vcmask 7168   ;;  %v168_v0 = vmov 0.0   ;;  %v35_v1 = vld [vmem:[%s205_s0] sm:$0xff]  ;;  %v36_v2 = vld [vmem:[#allocation3] sm:$0xff] }
   0x6   :  { %34 = vst.msk [vmem:[#allocation2] sm:$0xff] %vm33_vm0, %v168_v0  ;;  %v37_v3 = vsub.f32 %v35_v1, %v36_v2  ;;  %vm41_vm1 = vcmask 261120   ;;  %v51_v20 = vld [vmem:[%s207_s2] sm:$0xff]  ;;  %s169_s2 = smov [#allocation6]   ;;  %s98_s22 = sshll.u32 %s208_s3, 4  ;;  %s99_s22 = int_to_ptr.hbm [resolvable:$true] %s98_s22 }
   0x7   :  { %v67_v24 = vsub.f32 1.0, %v51_v20  ;;  %s96_s19 = sshll.u32 %s169_s2, 4  ;;  %s97_s19 = int_to_ptr.vmem [resolvable:$true] %s96_s19 }
   0x8   :  { %v38_v4 = vadd.f32 1e-06, %v37_v3 }
   0xa   :  { %v39_v5 = vmul.f32 %v38_v4, %v38_v4 }
   0xc   :  { %v42_v6 = vsel %vm41_vm1, %v39_v5, 0.0 }
   0xd   :  { %43 = vadd.xlane.f32.xlu0 %v42_v6  ;;  %v40_v7 = vld [vmem:[#allocation2] sm:$0xff] }
  0x80   :  { %v44_v8 = vpop.xlane.xlu0 %43 }
  0x81   :  { %v45_v9 = vadd.f32 %v44_v8, %v40_v7 }
  0x83   :  { %47 = vst.msk [vmem:[#allocation2] sm:$0xff] %vm33_vm0, %v45_v9 }
  0x8a   :  { %v52_v10 = vld [vmem:[#allocation2] sm:$0xff] }
  0x8b   :  { %113 = vrsqrt.f32 %v52_v10  ;;  %vm60_vm2 = vcmp.eq.f32.partialorder %v52_v10, inf  ;;  %v63_v18 = vand.u32 2147483648, %v52_v10  ;;  %vm62_vm3 = vcmp.eq.f32.partialorder %v52_v10, 0.0 }
  0x8c   :  { %v68_v26 = vmul.f32 %v67_v24, %v52_v10 }
  0x91   :  { %v114_v11 = vpop.eup %113 }
  0x92   :  { %v54_v12 = vmul.f32 %v114_v11, %v52_v10 }
  0x94   :  { %v55_v13 = vmul.f32 %v114_v11, %v54_v12 }
  0x96   :  { %v56_v14 = vmul.f32 0.5, %v55_v13 }
  0x98   :  { %v57_v15 = vsub.f32 1.5, %v56_v14 }
  0x9a   :  { %v58_v16 = vmul.f32 %v114_v11, %v57_v15 }
  0x9c   :  { %v59_v17 = vmul.f32 %v58_v16, %v52_v10 }
  0x9e   :  { %v61_v19 = vsel %vm60_vm2, %v52_v10, %v59_v17 }
  0x9f   :  { %v64_v21 = vsel %vm62_vm3, %v63_v18, %v61_v19 }
  0xa0   :  { %v65_v22 = vsub.f32 1.0, %v64_v21 }
  0xa2   :  { %v66_v23 = vmax.f32 %v65_v22, 0.0 }
  0xa4   :  { %v69_v25 = vmul.f32 %v66_v23, %v66_v23 }
  0xa6   :  { %v70_v27 = vmul.f32 %v69_v25, %v51_v20 }
  0xa8   :  { %v71_v28 = vadd.f32 %v70_v27, %v68_v26 }
  0xaa   :  { %v79_v29 = vsel %vm33_vm0, %v71_v28, 0.0 }
  0xab   :  { %80 = vadd.xlane.f32.xlu0 %v79_v29 }
 0x11e   :  { %v81_v30 = vpop.xlane.xlu0 %80 }
 0x11f   :  { %v82_v31 = vrot.slane %v81_v30, 4 }
 0x121   :  { %v83_v32 = vadd.f32 %v82_v31, %v81_v30 }
 0x123   :  { %v84_v33 = vrot.slane %v83_v32, 2 }
 0x125   :  { %v85_v34 = vadd.f32 %v84_v33, %v83_v32 }
 0x127   :  { %v86_v35 = vrot.slane %v85_v34, 1 }
 0x129   :  { %v87_v36 = vadd.f32 %v86_v35, %v85_v34 }
 0x12b   :  { %108 = vpush %v87_v36 }
 0x15c   :  { %s109_s23 = spop %108 }
 0x15d   :  { %v89_v37 = vstv %s109_s23 }
 0x15e   :  { %90 = vst [vmem:[#allocation6] sm:$0x1] %v89_v37 }
 0x15f   :  { %101 = dma.vmem_to_hbm [thread:$0]  %s97_s19, 16, %s99_s22, [#allocation5]  }
 0x160   :  { %165 = dma.done.wait [#allocation5], 16  }
 0x161   :  { %166 = vsyncadd [#allocation5], 4294967280 }
 0x162   :  { %106 = vsyncpa [#allocation4], 1 }
 0x163   :  { %107 = vsyncpa [#allocation5], 1 }

</bundles_post_ra>
